<compile_context>
chip_gen: v7x
topology: tpu7x:2x2x1
jax: 0.10.0
libtpu: 0.0.40
codegen_flags: <defaults>
</compile_context>

<pallas_src>
import functools
import math

import jax
import jax.numpy as jnp
from jax import lax
from jax.experimental import pallas as pl
from jax.experimental.pallas import tpu as pltpu


def _gelu(x):
    # TODO(synk): PyTorch nn.GELU() default is the erf-exact form; this is the tanh approximation
    # (guaranteed Mosaic lowering).  |delta| ~ 1e-3; the reference below uses the same form.
    return jax.nn.gelu(x, approximate=True)


def _round_up(x, m):
    return ((x + m - 1) // m) * m


def _default_batch_tile():
    # v5e/v6e: 128 MiB VMEM -> large tiles amortize the ~0.35us/step pipeline overhead.
    # v7x: 64 MiB VMEM + 2 TensorCores -> moderate tile, keep several grid steps.
    try:
        kind = jax.devices()[0].device_kind.lower()
    except Exception:
        return 256
    if "v5" in kind or "v6" in kind:
        return 512
    return 256


def _pointnet_kernel(xT_ref, w1_ref, b1_ref, w2_ref, b2_ref, w3_ref, b3_ref, o_ref,
                     *, tb, rpc, jpc):
    """One grid step: tb point clouds, rpc matmul rows per cloud, chunks of jpc*tb rows.

    xT_ref: (Cg, tb*rpc) bf16   channels-first, rows ordered (chunk-row j, cloud i)
    w1_ref: (Cg, Hp) f32        b1_ref: (1, Hp) f32
    w2_ref: (Hp, Hp) bf16       b2_ref: (1, Hp) f32
    w3_ref: (Hp, Dp) bf16       b3_ref: (1, Dp) f32
    o_ref : (tb, Dp) f32        per-cloud max (lane-dense writeback)
    """
    w1 = w1_ref[...]
    b1 = b1_ref[...]
    w2 = w2_ref[...]
    b2 = b2_ref[...]
    w3 = w3_ref[...]
    b3 = b3_ref[...]

    acc = None
    for c in range(rpc // jpc):
        lo = c * jpc * tb
        xt = xT_ref[:, lo:lo + jpc * tb].astype(jnp.float32)            # (Cg, jpc*tb)
        # Layer 1: contract the channel dim of both operands (transposed-LHS matmul).
        # Kept f32: K <= 16, negligible FLOPs, safest lowering.
        h = lax.dot_general(xt, w1, (((0,), (0,)), ((), ())),
                            preferred_element_type=jnp.float32)         # (jpc*tb, Hp)
        h = _gelu(h + b1)
        h = jnp.dot(h.astype(jnp.bfloat16), w2,
                    preferred_element_type=jnp.float32)                  # (jpc*tb, Hp)
        h = _gelu(h + b2)
        h = jnp.dot(h.astype(jnp.bfloat16), w3,
                    preferred_element_type=jnp.float32) + b3             # (jpc*tb, Dp)
        # Per-cloud max over this chunk's jpc row groups: tile-aligned tb-row slabs -> pure
        # VPU maxes, no reshape/relayout, no cross-lane work.
        m = h[0:tb]
        for j in range(1, jpc):
            m = jnp.maximum(m, h[j * tb:(j + 1) * tb])
        acc = m if acc is None else jnp.maximum(acc, m)
    o_ref[...] = acc


def pointnet_forward(coords, params, *, batch_tile=None):
    """coords: (..., P, C) float32.  Returns (..., D) float32 (matches the torch forward)."""
    if batch_tile is None:
        batch_tile = _default_batch_tile()
    lead = coords.shape[:-2]
    P, C = coords.shape[-2:]
    x = coords.reshape((-1, P, C)).astype(jnp.float32)
    B = x.shape[0]
    w1, b1, w2, b2, w3, b3 = params                 # (C,H),(1,H),(H,H),(1,H),(H,D),(1,D)
    H = w1.shape[1]
    D = w3.shape[1]

    # --- lane-packing factor: G points per 128-lane matmul row when H (== D) is narrow ---
    if H == D and H < 128 and 128 % H == 0:
        G = 128 // H
    else:
        G = 1

    # Pad the points axis to a multiple of G by replicating point 0 (max-pool invariant).
    P_pad = _round_up(P, G)
    if P_pad != P:
        x = jnp.concatenate([x, jnp.broadcast_to(x[:, :1, :], (B, P_pad - P, C))], axis=1)
    rpc = P_pad // G          # matmul rows per point cloud
    Cg = G * C                # channels per packed row

    # --- block-structured / block-diagonal padded weights (padded lanes stay exactly 0) ---
    Hp = _round_up(G * H, 128)
    Dp = _round_up(G * D, 128)
    f32 = jnp.float32

    def _bdiag(w):
        return jnp.kron(jnp.eye(G, dtype=f32), w.astype(f32))

    def _tile_bias(b, n, n_pad):
        return jnp.zeros((1, n_pad), f32).at[:, :G * n].set(
            jnp.tile(b.reshape(1, n).astype(f32), (1, G)))

    w1p = jnp.zeros((Cg, Hp), f32).at[:, :G * H].set(_bdiag(w1))                    # f32
    b1p = _tile_bias(b1, H, Hp)
    w2p = jnp.zeros((Hp, Hp), f32).at[:G * H, :G * H].set(_bdiag(w2)).astype(jnp.bfloat16)
    b2p = _tile_bias(b2, H, Hp)
    w3p = jnp.zeros((Hp, Dp), f32).at[:G * H, :G * D].set(_bdiag(w3)).astype(jnp.bfloat16)
    b3p = _tile_bias(b3, D, Dp)

    # --- batch tiling: tb multiple of `align` keeps every block lane/sublane aligned ---
    align = max(8, 128 // math.gcd(rpc, 128))       # tb*rpc % 128 == 0 and tb % 8 == 0
    tb_cap = _round_up(batch_tile, align)
    tb = min(tb_cap, _round_up(max(1, (B + 1) // 2), align))   # >=2 grid steps for v7x dual-TC
    tb = max(tb, align)
    Bp = _round_up(B, tb)
    if Bp != B:
        x = jnp.concatenate([x, jnp.zeros((Bp - B, P_pad, C), x.dtype)], axis=0)
    nb = Bp // tb

    # In-kernel row-chunk size: jpc row groups (jpc | rpc) of tb rows, ~<=512 rows per chunk,
    # with 128-lane-aligned chunk boundaries.  Fallback: a single chunk (always valid).
    if rpc * tb <= 512:
        jpc = rpc
    else:
        jpc = rpc
        for d in range(rpc - 1, 0, -1):
            if rpc % d == 0 and d * tb <= 512 and (d * tb) % 128 == 0:
                jpc = d
                break

    # --- channels-first, per-block (chunk-row, cloud) ordered layout: lane-dense x DMA ---
    xr = x.reshape(nb, tb, rpc, Cg).transpose(0, 2, 1, 3)          # (nb, rpc, tb, Cg)
    xT = xr.reshape(nb * rpc * tb, Cg).T.astype(jnp.bfloat16)      # (Cg, Bp*rpc)

    flops = 2 * Bp * rpc * (Cg * Hp + Hp * Hp + Hp * Dp)
    transcendentals = 2 * Bp * rpc * Hp
    bytes_accessed = (2 * Bp * rpc * Cg + 4 * Bp * Dp
                      + 4 * Cg * Hp + 2 * Hp * Hp + 2 * Hp * Dp + 4 * (2 * Hp + Dp))

    kernel = functools.partial(_pointnet_kernel, tb=tb, rpc=rpc, jpc=jpc)
    out = pl.pallas_call(
        kernel,
        out_shape=jax.ShapeDtypeStruct((Bp, Dp), jnp.float32),
        grid_spec=pltpu.PrefetchScalarGridSpec(
            num_scalar_prefetch=0,
            grid=(nb,),
            in_specs=[
                pl.BlockSpec((Cg, tb * rpc), lambda b: (0, b)),
                # Constant-index weight/bias blocks stay resident in VMEM across grid steps.
                pl.BlockSpec((Cg, Hp), lambda b: (0, 0)),
                pl.BlockSpec((1, Hp), lambda b: (0, 0)),
                pl.BlockSpec((Hp, Hp), lambda b: (0, 0)),
                pl.BlockSpec((1, Hp), lambda b: (0, 0)),
                pl.BlockSpec((Hp, Dp), lambda b: (0, 0)),
                pl.BlockSpec((1, Dp), lambda b: (0, 0)),
            ],
            out_specs=pl.BlockSpec((tb, Dp), lambda b: (b, 0)),
        ),
        compiler_params=pltpu.CompilerParams(dimension_semantics=("parallel",)),
        cost_estimate=pl.CostEstimate(flops=flops, transcendentals=transcendentals,
                                      bytes_accessed=bytes_accessed),
    )(xT, w1p, b1p, w2p, b2p, w3p, b3p)

    # Discard padded batch rows / padded lanes and fold the G lane groups (tiny wrapper-side max).
    out = out[:B, :G * D].reshape(B, G, D)
    out = jnp.max(out, axis=1)
    return out.reshape(lead + (D,))


def pointnet_ref(coords, params):
    """Pure-JAX (f32) reference of the PyTorch forward pass."""
    w1, b1, w2, b2, w3, b3 = params
    h = _gelu(coords @ w1 + b1)
    h = _gelu(h @ w2 + b2)
    h = h @ w3 + b3
    return jnp.max(h, axis=-2)


def make_params(key, point_channels, hidden_dim, output_dim):
    """Deterministic synthetic parameters (shapes implied by build_mlp with hidden_depth=2)."""
    ks = jax.random.split(key, 6)
    scale = 0.1
    w1 = scale * jax.random.normal(ks[0], (point_channels, hidden_dim), jnp.float32)
    b1 = scale * jax.random.normal(ks[1], (1, hidden_dim), jnp.float32)
    w2 = scale * jax.random.normal(ks[2], (hidden_dim, hidden_dim), jnp.float32)
    b2 = scale * jax.random.normal(ks[3], (1, hidden_dim), jnp.float32)
    w3 = scale * jax.random.normal(ks[4], (hidden_dim, output_dim), jnp.float32)
    b3 = scale * jax.random.normal(ks[5], (1, output_dim), jnp.float32)
    return (w1, b1, w2, b2, w3, b3)


if __name__ == "__main__":
    # Small shapes consistent with the module (default config: no ee-embedding, no mean-subtract).
    B, P, C = 2, 16, 3          # batch, points, point_channels (n_coordinates=3)
    H, D = 32, 32               # hidden_dim, output_dim ; hidden_depth = 2

    key = jax.random.PRNGKey(0)
    k_x, k_p, k_x2 = jax.random.split(key, 3)
    coords = jax.random.normal(k_x, (B, P, C), jnp.float32)
    params = make_params(k_p, C, H, D)

    x = {"coordinate": coords}  # PointNet.forward takes a dict; default config only uses coords

    out = jax.block_until_ready(pointnet_forward(x["coordinate"], params))
    ref = pointnet_ref(x["coordinate"], params)
    assert out.shape == (B, D), out.shape
    err = float(jnp.max(jnp.abs(out - ref)))
    assert err < 2e-2, err      # bf16 operands on layers 2/3 -> ~1e-3 abs error at these scales

    # Second check: multi-step grid, batch padding, >=2 "parallel" steps.
    B2 = 70
    coords2 = jax.random.normal(k_x2, (B2, P, C), jnp.float32)
    out2 = jax.block_until_ready(pointnet_forward(coords2, params))
    ref2 = pointnet_ref(coords2, params)
    assert out2.shape == (B2, D), out2.shape
    err2 = float(jnp.max(jnp.abs(out2 - ref2)))
    assert err2 < 2e-2, err2

    print("KERNEL_OK")
</pallas_src>

<mosaic_0001>
module attributes {stable_mosaic.version = 11 : i64} {
  func.func @_pointnet_kernel(%arg0: i32, %arg1: memref<12x128xbf16, #tpu.memory_space<vmem>>, %arg2: memref<12x128xf32, #tpu.memory_space<vmem>>, %arg3: memref<1x128xf32, #tpu.memory_space<vmem>>, %arg4: memref<128x128xbf16, #tpu.memory_space<vmem>>, %arg5: memref<1x128xf32, #tpu.memory_space<vmem>>, %arg6: memref<128x128xbf16, #tpu.memory_space<vmem>>, %arg7: memref<1x128xf32, #tpu.memory_space<vmem>>, %arg8: memref<32x128xf32, #tpu.memory_space<vmem>>) attributes {dimension_semantics = [#tpu.dimension_semantics<parallel>], iteration_bounds = array<i64: 1>, scalar_prefetch = 0 : i64, scratch_operands = 0 : i64, tpu.core_type = #tpu.core_type<tc>, window_params = [{transform_indices = @transform_0, window_bounds = array<i64: 12, 128>}, {pipeline_mode = #tpu.pipeline_mode<synchronous>, transform_indices = @transform_1, window_bounds = array<i64: 12, 128>}, {pipeline_mode = #tpu.pipeline_mode<synchronous>, transform_indices = @transform_2, window_bounds = array<i64: 1, 128>}, {pipeline_mode = #tpu.pipeline_mode<synchronous>, transform_indices = @transform_3, window_bounds = array<i64: 128, 128>}, {pipeline_mode = #tpu.pipeline_mode<synchronous>, transform_indices = @transform_4, window_bounds = array<i64: 1, 128>}, {pipeline_mode = #tpu.pipeline_mode<synchronous>, transform_indices = @transform_5, window_bounds = array<i64: 128, 128>}, {pipeline_mode = #tpu.pipeline_mode<synchronous>, transform_indices = @transform_6, window_bounds = array<i64: 1, 128>}, {transform_indices = @transform_7, window_bounds = array<i64: 32, 128>}]} {
    %c0 = arith.constant 0 : index
    %c0_0 = arith.constant 0 : index
    %0 = vector.load %arg2[%c0, %c0_0] : memref<12x128xf32, #tpu.memory_space<vmem>>, vector<12x128xf32>
    %c0_1 = arith.constant 0 : index
    %c0_2 = arith.constant 0 : index
    %1 = vector.load %arg3[%c0_1, %c0_2] : memref<1x128xf32, #tpu.memory_space<vmem>>, vector<1x128xf32>
    %c0_3 = arith.constant 0 : index
    %c0_4 = arith.constant 0 : index
    %2 = vector.load %arg4[%c0_3, %c0_4] : memref<128x128xbf16, #tpu.memory_space<vmem>>, vector<128x128xbf16>
    %c0_5 = arith.constant 0 : index
    %c0_6 = arith.constant 0 : index
    %3 = vector.load %arg5[%c0_5, %c0_6] : memref<1x128xf32, #tpu.memory_space<vmem>>, vector<1x128xf32>
    %c0_7 = arith.constant 0 : index
    %c0_8 = arith.constant 0 : index
    %4 = vector.load %arg6[%c0_7, %c0_8] : memref<128x128xbf16, #tpu.memory_space<vmem>>, vector<128x128xbf16>
    %c0_9 = arith.constant 0 : index
    %c0_10 = arith.constant 0 : index
    %5 = vector.load %arg7[%c0_9, %c0_10] : memref<1x128xf32, #tpu.memory_space<vmem>>, vector<1x128xf32>
    %c0_11 = arith.constant 0 : index
    %c0_12 = arith.constant 0 : index
    %6 = vector.load %arg1[%c0_11, %c0_12] : memref<12x128xbf16, #tpu.memory_space<vmem>>, vector<12x128xbf16>
    %7 = arith.extf %6 : vector<12x128xbf16> to vector<12x128xf32>
    %cst = arith.constant dense<0.000000e+00> : vector<128x128xf32>
    %8 = tpu.matmul %7, %0, %cst {dimension_numbers = #tpu.dot_dimension_numbers<[0], [0], [1], [1], [0, 1, 1, 1], [], []>} : vector<12x128xf32>, vector<12x128xf32>, vector<128x128xf32> -> vector<128x128xf32>
    %9 = vector.broadcast %1 : vector<1x128xf32> to vector<128x128xf32>
    %10 = arith.addf %8, %9 : vector<128x128xf32>
    %11 = arith.mulf %10, %10 : vector<128x128xf32>
    %12 = arith.mulf %10, %11 : vector<128x128xf32>
    %cst_13 = arith.constant 4.471500e-02 : f32
    %13 = vector.broadcast %cst_13 : f32 to vector<128x128xf32>
    %14 = arith.mulf %13, %12 : vector<128x128xf32>
    %15 = arith.addf %10, %14 : vector<128x128xf32>
    %cst_14 = arith.constant 0.797884583 : f32
    %16 = vector.broadcast %cst_14 : f32 to vector<128x128xf32>
    %17 = arith.mulf %16, %15 : vector<128x128xf32>
    %18 = math.tanh %17 : vector<128x128xf32>
    %cst_15 = arith.constant 1.000000e+00 : f32
    %19 = vector.broadcast %cst_15 : f32 to vector<128x128xf32>
    %20 = arith.addf %19, %18 : vector<128x128xf32>
    %cst_16 = arith.constant 5.000000e-01 : f32
    %21 = vector.broadcast %cst_16 : f32 to vector<128x128xf32>
    %22 = arith.mulf %21, %20 : vector<128x128xf32>
    %23 = arith.mulf %10, %22 : vector<128x128xf32>
    %24 = arith.truncf %23 : vector<128x128xf32> to vector<128x128xbf16>
    %cst_17 = arith.constant dense<0.000000e+00> : vector<128x128xf32>
    %25 = tpu.matmul %24, %2, %cst_17 {dimension_numbers = #tpu.dot_dimension_numbers<[1], [0], [0], [1], [0, 0, 1, 1], [], []>} : vector<128x128xbf16>, vector<128x128xbf16>, vector<128x128xf32> -> vector<128x128xf32>
    %26 = vector.broadcast %3 : vector<1x128xf32> to vector<128x128xf32>
    %27 = arith.addf %25, %26 : vector<128x128xf32>
    %28 = arith.mulf %27, %27 : vector<128x128xf32>
    %29 = arith.mulf %27, %28 : vector<128x128xf32>
    %cst_18 = arith.constant 4.471500e-02 : f32
    %30 = vector.broadcast %cst_18 : f32 to vector<128x128xf32>
    %31 = arith.mulf %30, %29 : vector<128x128xf32>
    %32 = arith.addf %27, %31 : vector<128x128xf32>
    %cst_19 = arith.constant 0.797884583 : f32
    %33 = vector.broadcast %cst_19 : f32 to vector<128x128xf32>
    %34 = arith.mulf %33, %32 : vector<128x128xf32>
    %35 = math.tanh %34 : vector<128x128xf32>
    %cst_20 = arith.constant 1.000000e+00 : f32
    %36 = vector.broadcast %cst_20 : f32 to vector<128x128xf32>
    %37 = arith.addf %36, %35 : vector<128x128xf32>
    %cst_21 = arith.constant 5.000000e-01 : f32
    %38 = vector.broadcast %cst_21 : f32 to vector<128x128xf32>
    %39 = arith.mulf %38, %37 : vector<128x128xf32>
    %40 = arith.mulf %27, %39 : vector<128x128xf32>
    %41 = arith.truncf %40 : vector<128x128xf32> to vector<128x128xbf16>
    %cst_22 = arith.constant dense<0.000000e+00> : vector<128x128xf32>
    %42 = tpu.matmul %41, %4, %cst_22 {dimension_numbers = #tpu.dot_dimension_numbers<[1], [0], [0], [1], [0, 0, 1, 1], [], []>} : vector<128x128xbf16>, vector<128x128xbf16>, vector<128x128xf32> -> vector<128x128xf32>
    %43 = vector.broadcast %5 : vector<1x128xf32> to vector<128x128xf32>
    %44 = arith.addf %42, %43 : vector<128x128xf32>
    %45 = vector.extract_strided_slice %44 {offsets = [0, 0], sizes = [32, 128], strides = [1, 1]} : vector<128x128xf32> to vector<32x128xf32>
    %46 = vector.extract_strided_slice %44 {offsets = [32, 0], sizes = [32, 128], strides = [1, 1]} : vector<128x128xf32> to vector<32x128xf32>
    %47 = arith.maximumf %45, %46 : vector<32x128xf32>
    %48 = vector.extract_strided_slice %44 {offsets = [64, 0], sizes = [32, 128], strides = [1, 1]} : vector<128x128xf32> to vector<32x128xf32>
    %49 = arith.maximumf %47, %48 : vector<32x128xf32>
    %50 = vector.extract_strided_slice %44 {offsets = [96, 0], sizes = [32, 128], strides = [1, 1]} : vector<128x128xf32> to vector<32x128xf32>
    %51 = arith.maximumf %49, %50 : vector<32x128xf32>
    %c0_23 = arith.constant 0 : index
    %c0_24 = arith.constant 0 : index
    %52 = vector.load %arg8[%c0_23, %c0_24] : memref<32x128xf32, #tpu.memory_space<vmem>>, vector<32x128xf32>
    tpu.vector_store %arg8[%c0_23, %c0_24], %51 {strides = array<i32>} : memref<32x128xf32, #tpu.memory_space<vmem>>, vector<32x128xf32>,
    return
  }
  func.func @transform_0(%arg0: i32) -> (i32, i32) {
    %c0_i32 = arith.constant 0 : i32
    %c0_i32_0 = arith.constant 0 : i32
    return %c0_i32, %arg0 : i32, i32
  }
  func.func @transform_1(%arg0: i32) -> (i32, i32) {
    %c0_i32 = arith.constant 0 : i32
    %c0_i32_0 = arith.constant 0 : i32
    %c0_i32_1 = arith.constant 0 : i32
    return %c0_i32, %c0_i32_0 : i32, i32
  }
  func.func @transform_2(%arg0: i32) -> (i32, i32) {
    %c0_i32 = arith.constant 0 : i32
    %c0_i32_0 = arith.constant 0 : i32
    %c0_i32_1 = arith.constant 0 : i32
    return %c0_i32, %c0_i32_0 : i32, i32
  }
  func.func @transform_3(%arg0: i32) -> (i32, i32) {
    %c0_i32 = arith.constant 0 : i32
    %c0_i32_0 = arith.constant 0 : i32
    %c0_i32_1 = arith.constant 0 : i32
    return %c0_i32, %c0_i32_0 : i32, i32
  }
  func.func @transform_4(%arg0: i32) -> (i32, i32) {
    %c0_i32 = arith.constant 0 : i32
    %c0_i32_0 = arith.constant 0 : i32
    %c0_i32_1 = arith.constant 0 : i32
    return %c0_i32, %c0_i32_0 : i32, i32
  }
  func.func @transform_5(%arg0: i32) -> (i32, i32) {
    %c0_i32 = arith.constant 0 : i32
    %c0_i32_0 = arith.constant 0 : i32
    %c0_i32_1 = arith.constant 0 : i32
    return %c0_i32, %c0_i32_0 : i32, i32
  }
  func.func @transform_6(%arg0: i32) -> (i32, i32) {
    %c0_i32 = arith.constant 0 : i32
    %c0_i32_0 = arith.constant 0 : i32
    %c0_i32_1 = arith.constant 0 : i32
    return %c0_i32, %c0_i32_0 : i32, i32
  }
  func.func @transform_7(%arg0: i32) -> (i32, i32) {
    %c0_i32 = arith.constant 0 : i32
    %c0_i32_0 = arith.constant 0 : i32
    return %arg0, %c0_i32 : i32, i32
  }
}

</mosaic_0001>

<bundles_post_ra>
// kernel: tpu_custom_call.1
= control target key start
LH: loop header
LB: loop body
LE: loop exit
PB: predicated region body
PF: predicated region fallthrough
CT: control target
= control target key end

     0   :  { %12 = vsyncpa [#allocation3], 0  ;;  %s1769_s0 = inlined_call_operand.hbm [shape: bf16[12,128], index: 0, kind: input, shape index: {}]   ;;  %s1770_s1 = inlined_call_operand.hbm [shape: f32[12,128], index: 1, kind: input, shape index: {}]   ;;  %s1771_s2 = inlined_call_operand.vmem [shape: f32[1,128], index: 2, kind: input, shape index: {}]   ;;  %s1772_s3 = inlined_call_operand.hbm [shape: bf16[128,128], index: 3, kind: input, shape index: {}]   ;;  %s1773_s4 = inlined_call_operand.vmem [shape: f32[1,128], index: 4, kind: input, shape index: {}]   ;;  %s1774_s5 = inlined_call_operand.hbm [shape: bf16[128,128], index: 5, kind: input, shape index: {}]   ;;  %s1775_s6 = inlined_call_operand.vmem [shape: f32[1,128], index: 6, kind: input, shape index: {}]   ;;  %s1776_s7 = inlined_call_operand.hbm [shape: f32[32,128], index: 7, kind: output, shape index: {}]  }
   0x1   :  { %13 = vsyncpa [#allocation6], 0 }
   0x2   :  { %14 = vsyncpa [#allocation9], 0 }
   0x3   :  { %15 = vsyncpa [#allocation4], 0  ;;  %s1394_s24 = smov [#allocation5]   ;;  %s1276_s28 = scalar_lea.hbm %s1770_s1, 256 }
   0x4   :  { %s33_s25 = sshll.u32 %s1394_s24, 4  ;;  %p1277_p0 = scmp.ne.s32.totalorder %s1770_s1, %s1276_s28  ;;  %s34_s25 = int_to_ptr.vmem [resolvable:$true] %s33_s25 }
   0x5   :  { %p1280_p1 = scmp.lt.u32.totalorder %s1276_s28, %s1770_s1 }
   0x7   :  { %p1282_p2 = pnand %p1280_p1, %p1277_p0 }
   0x9   :  { %1285 = shalt.err (!%p1282_p2)
}
   0xa   :  { %s1286_s10 = scalar_lea.vmem %s34_s25, 256  ;;  %p1291_p4 = scmp.lt.s32.totalorder %s34_s25, %s34_s25 }
   0xb   :  { %p1287_p3 = scmp.ne.s32.totalorder %s34_s25, %s1286_s10  ;;  %p1292_p5 = scmp.lt.s32.totalorder %s1286_s10, %s1286_s10 }
   0xd   :  { %p1293_p6 = por %p1292_p5, %p1291_p4 }
   0xf   :  { %p1294_p7 = pnand %p1293_p6, %p1287_p3 }
  0x11   :  { %1297 = shalt.err (!%p1294_p7)
}
  0x12   :  { %s1395_s11 = smov 128   ;;  %s1396_s12 = smov 8  }
  0x13   :  { %39 = dma.hbm_to_vmem [thread:$0]  %s1770_s1, 256, %s34_s25, [#allocation6], %s1395_s11, %s1395_s11, %s1396_s12  }
  0x14   :  { %s1397_s15 = smov [#allocation2]   ;;  %s1298_s19 = scalar_lea.hbm %s1769_s0, 128 }
  0x15   :  { %s21_s16 = sshll.u32 %s1397_s15, 4  ;;  %p1299_p8 = scmp.ne.s32.totalorder %s1769_s0, %s1298_s19  ;;  %s22_s16 = int_to_ptr.vmem [resolvable:$true] %s21_s16 }
  0x16   :  { %p1302_p9 = scmp.lt.u32.totalorder %s1298_s19, %s1769_s0 }
  0x18   :  { %p1304_p10 = pnand %p1302_p9, %p1299_p8 }
  0x1a   :  { %1307 = shalt.err (!%p1304_p10)
}
  0x1b   :  { %s1308_s24 = scalar_lea.vmem %s22_s16, 128  ;;  %p1313_p12 = scmp.lt.s32.totalorder %s22_s16, %s22_s16 }
  0x1c   :  { %p1309_p11 = scmp.ne.s32.totalorder %s22_s16, %s1308_s24  ;;  %p1314_p13 = scmp.lt.s32.totalorder %s1308_s24, %s1308_s24 }
  0x1e   :  { %p1315_p0 = por %p1314_p13, %p1313_p12 }
  0x20   :  { %p1316_p1 = pnand %p1315_p0, %p1309_p11 }
  0x22   :  { %1319 = shalt.err (!%p1316_p1)
}
  0x23   :  { %s1398_s1 = smov 64   ;;  %s1399_s25 = smov 4  }
  0x24   :  { %27 = dma.hbm_to_vmem [thread:$0]  %s1769_s0, 128, %s22_s16, [#allocation3], %s1398_s1, %s1398_s1, %s1399_s25  }
  0x25   :  { %s1400_s28 = smov [#allocation7]   ;;  %s1401_s30 = smov [#allocation8]  }
  0x26   :  { %s47_s29 = sshll.u32 %s1400_s28, 4  ;;  %s61_s8 = sshll.u32 %s1401_s30, 4  ;;  %s48_s29 = int_to_ptr.vmem [resolvable:$true] %s47_s29  ;;  %s1474_s8 = int_to_ptr.vmem [resolvable:$true] %s61_s8 }
  0x27   :  { %s1320_s13 = scalar_lea.hbm %s1772_s3, 1024 }
  0x28   :  { %p1321_p2 = scmp.ne.s32.totalorder %s1772_s3, %s1320_s13  ;;  %p1324_p3 = scmp.lt.u32.totalorder %s1320_s13, %s1772_s3 }
  0x2a   :  { %p1326_p4 = pnand %p1324_p3, %p1321_p2 }
  0x2c   :  { %1329 = shalt.err (!%p1326_p4)
}
  0x2d   :  { %s1330_s0 = scalar_lea.vmem %s48_s29, 1024  ;;  %p1335_p6 = scmp.lt.s32.totalorder %s48_s29, %s48_s29 }
  0x2e   :  { %p1331_p5 = scmp.ne.s32.totalorder %s48_s29, %s1330_s0  ;;  %p1336_p7 = scmp.lt.s32.totalorder %s1330_s0, %s1330_s0 }
  0x30   :  { %p1337_p8 = por %p1336_p7, %p1335_p6 }
  0x32   :  { %p1338_p9 = pnand %p1337_p8, %p1331_p5 }
  0x34   :  { %1341 = shalt.err (!%p1338_p9)
}
  0x35   :  { %53 = dma.hbm_to_vmem [thread:$0]  %s1772_s3, 1024, %s48_s29, [#allocation6], %s1398_s1, %s1398_s1, %s1399_s25  }
  0x36   :  { %s1342_s22 = scalar_lea.hbm %s1774_s5, 1024 }
  0x37   :  { %p1343_p10 = scmp.ne.s32.totalorder %s1774_s5, %s1342_s22  ;;  %p1346_p11 = scmp.lt.u32.totalorder %s1342_s22, %s1774_s5 }
  0x39   :  { %p1348_p12 = pnand %p1346_p11, %p1343_p10 }
  0x3b   :  { %1351 = shalt.err (!%p1348_p12)
}
  0x3c   :  { %s1352_s28 = scalar_lea.vmem %s1474_s8, 1024  ;;  %p1357_p0 = scmp.lt.s32.totalorder %s1474_s8, %s1474_s8 }
  0x3d   :  { %p1353_p13 = scmp.ne.s32.totalorder %s1474_s8, %s1352_s28  ;;  %p1358_p1 = scmp.lt.s32.totalorder %s1352_s28, %s1352_s28 }
  0x3f   :  { %p1359_p2 = por %p1358_p1, %p1357_p0 }
  0x41   :  { %p1360_p3 = pnand %p1359_p2, %p1353_p13 }
  0x43   :  { %1363 = shalt.err (!%p1360_p3)
}
  0x44   :  { %67 = dma.hbm_to_vmem [thread:$0]  %s1774_s5, 1024, %s1474_s8, [#allocation9], %s1398_s1, %s1398_s1, %s1399_s25  }
  0x45   :  { %1386 = dma.done.wait [#allocation3], 128  }
  0x46   :  { %1387 = vsyncadd [#allocation3], 4294967168 }
  0x47   :  { %1388 = dma.done.wait [#allocation6], 1280  }
  0x48   :  { %1389 = vsyncadd [#allocation6], 4294966016 }
  0x49   :  { %1390 = dma.done.wait [#allocation9], 1024  }
  0x4a   :  { %1391 = vsyncadd [#allocation9], 4294966272  ;;  %v120_v0 = vld [vmem:[#allocation2] sm:$0xf]  ;;  %v121_v1 = vld [vmem:[#allocation2 + $0x4] sm:$0x3] }
  0x4b   :  { %v122_v2 = vunpack.c.l.bf16 %v120_v0  ;;  %v83_v3 = vld [vmem:[#allocation5] sm:$0xff]  ;;  %v84_v4 = vld [vmem:[#allocation5 + $0x8] sm:$0xf]  ;;  %vm211_vm0 = vcmask 1043456   ;;  %v123_v6 = vunpack.c.l.bf16 %v121_v1  ;;  %vm1402_vm1 = vmmov 1   ;;  %v1196_v23 = vld [vmem:[#allocation7] sm:$0xff]  }
  0x4c   :  { %v1179_v5 = vpack.c.bf16 %v84_v4, %v83_v3  ;;  %vm1180_vm2 = vmpackc.low %vm211_vm0, %vm1402_vm1  ;;  %vm162_vm3 = vcmask 97280   ;;  %1115 = vmatprep.subr.bf16.mxu1 %v1196_v23  ;;  %v1197_v24 = vld [vmem:[#allocation7 + $0x8] sm:$0xff]   ;;  %v1198_v25 = vld [vmem:[#allocation7 + $0x10] sm:$0xff]  }
  0x4d   :  { %130 = vxpose.xlu0.b32.start [1/2] (short) %v122_v2, 128  ;;  %1116 = vmatpush3.bf16.msra.mxu1 %v1196_v23  ;;  %v1199_v26 = vld [vmem:[#allocation7 + $0x18] sm:$0xff]   ;;  %v1200_v27 = vld [vmem:[#allocation7 + $0x20] sm:$0xff]   ;;  %v1201_v28 = vld [vmem:[#allocation7 + $0x28] sm:$0xff]  }
  0x4e   :  { %1181 = vmatprep.subr.msk.bf16.mxu0 %vm1180_vm2, %v1179_v5  ;;  %1117 = vmatprep.subr.bf16.mxu1 %v1197_v24  ;;  %v1202_v29 = vld [vmem:[#allocation7 + $0x30] sm:$0xff]   ;;  %v1203_v30 = vld [vmem:[#allocation7 + $0x38] sm:$0xff]   ;;  %v1530_v31 = vld [vmem:[%s1771_s2] ss:$0 sm:$0xff] }
  0x4f   :  { %1184 = vmatpush3.bf16.msk.msra.mxu0 %vm1180_vm2, %v1179_v5 }
  0x51   :  { %131 = vxpose.xlu0.b32.end [2/2] (short) %v123_v6, 128  ;;  %1118 = vmatpush3.bf16.msra.mxu1 %v1197_v24 }
  0x52   :  { %1119 = vmatprep.subr.bf16.mxu1 %v1198_v25 }
  0x55   :  { %1120 = vmatpush3.bf16.msra.mxu1 %v1198_v25 }
  0x56   :  { %1121 = vmatprep.subr.bf16.mxu1 %v1199_v26 }
  0x59   :  { %1122 = vmatpush3.bf16.msra.mxu1 %v1199_v26 }
  0x5a   :  { %1123 = vmatprep.subr.bf16.mxu1 %v1200_v27 }
  0x5d   :  { %1124 = vmatpush3.bf16.msra.mxu1 %v1200_v27 }
  0x5e   :  { %1125 = vmatprep.subr.bf16.mxu1 %v1201_v28 }
  0x61   :  { %1126 = vmatpush3.bf16.msra.mxu1 %v1201_v28 }
  0x62   :  { %1127 = vmatprep.subr.bf16.mxu1 %v1202_v29 }
  0x65   :  { %1128 = vmatpush3.bf16.msra.mxu1 %v1202_v29 }
  0x66   :  { %1129 = vmatprep.subr.bf16.mxu1 %v1203_v30 }
  0x69   :  { %1130 = vmatpush3.bf16.msra.mxu1 %v1203_v30 }
  0xcd   :  { %v146_v7 = vpop.trf.xlu0 }
  0xce   :  { %1091 = vmatprep.mubr.msk.f32.mxu0 %vm162_vm3, %v146_v7 }
  0xd1   :  { %v147_v8 = vpop.trf.xlu0 }
  0xd2   :  { %1092 = vmatmul.mubr.msk.f32.vlgmr.msra.gmra.mrb[0].mxu0 %vm162_vm3, %v147_v8 }
  0xd5   :  { %v148_v9 = vpop.trf.xlu0 }
  0xd6   :  { %1094 = vmatprep.mubr.msk.f32.mxu0 %vm162_vm3, %v148_v9 }
  0xd9   :  { %v149_v10 = vpop.trf.xlu0 }
  0xda   :  { %1095 = vmatmul.mubr.msk.f32.gmra.mrb[2].mxu0 %vm162_vm3, %v149_v10 }
  0xdd   :  { %v150_v11 = vpop.trf.xlu0 }
  0xde   :  { %1097 = vmatprep.mubr.msk.f32.mxu0 %vm162_vm3, %v150_v11 }
  0xe1   :  { %v151_v12 = vpop.trf.xlu0 }
  0xe2   :  { %1098 = vmatmul.mubr.msk.f32.gmra.mrb[4].mxu0 %vm162_vm3, %v151_v12 }
  0xe5   :  { %v152_v13 = vpop.trf.xlu0 }
  0xe6   :  { %1100 = vmatprep.mubr.msk.f32.mxu0 %vm162_vm3, %v152_v13 }
  0xe9   :  { %v153_v14 = vpop.trf.xlu0 }
  0xea   :  { %1101 = vmatmul.mubr.msk.f32.gmra.mrb[6].mxu0 %vm162_vm3, %v153_v14 }
  0xed   :  { %v154_v15 = vpop.trf.xlu0 }
  0xee   :  { %1103 = vmatprep.mubr.msk.f32.mxu0 %vm162_vm3, %v154_v15 }
  0xf1   :  { %v155_v16 = vpop.trf.xlu0 }
  0xf2   :  { %1104 = vmatmul.mubr.msk.f32.gmra.mrb[8].mxu0 %vm162_vm3, %v155_v16 }
  0xf5   :  { %v156_v17 = vpop.trf.xlu0 }
  0xf6   :  { %1106 = vmatprep.mubr.msk.f32.mxu0 %vm162_vm3, %v156_v17 }
  0xf9   :  { %v157_v18 = vpop.trf.xlu0 }
  0xfa   :  { %1107 = vmatmul.mubr.msk.f32.gmra.mrb[10].mxu0 %vm162_vm3, %v157_v18 }
  0xfd   :  { %v158_v19 = vpop.trf.xlu0 }
  0xfe   :  { %1109 = vmatprep.mubr.msk.f32.mxu0 %vm162_vm3, %v158_v19 }
 0x101   :  { %v159_v20 = vpop.trf.xlu0 }
 0x102   :  { %1110 = vmatmul.mubr.msk.f32.gmra.mrb[12].mxu0 %vm162_vm3, %v159_v20 }
 0x105   :  { %v160_v21 = vpop.trf.xlu0 }
 0x106   :  { %1112 = vmatprep.mubr.msk.f32.mxu0 %vm162_vm3, %v160_v21 }
 0x109   :  { %v161_v22 = vpop.trf.xlu0 }
 0x10a   :  { %1113 = vmatmul.mubr.msk.f32.gmra.mrb[14].mxu0 %vm162_vm3, %v161_v22 }
 0x1a5   :  { %v1093_v32 = vpop.f32.mrb[0].mxu0 }
 0x1a6   :  { %v287_v33 = vadd.f32 %v1093_v32, %v1530_v31  ;;  %v281_v34 = vpop.f32.mrb[1].mxu0 }
 0x1a7   :  { %v282_v35 = vadd.f32 %v1530_v31, %v281_v34 }
 0x1a8   :  { %v361_v36 = vmul.f32 %v287_v33, %v287_v33 }
 0x1a9   :  { %v360_v37 = vmul.f32 %v282_v35, %v282_v35 }
 0x1aa   :  { %v377_v38 = vmul.f32 %v361_v36, %v287_v33 }
 0x1ab   :  { %v376_v39 = vmul.f32 %v360_v37, %v282_v35 }
 0x1ac   :  { %v393_v40 = vmul.f32 0.044715, %v377_v38 }
 0x1ad   :  { %v392_v41 = vmul.f32 0.044715, %v376_v39  ;;  %v1096_v42 = vpop.f32.mrb[2].mxu0 }
 0x1ae   :  { %v1535_v43 = vadd.f32 %v1096_v42, %v1530_v31  ;;  %v291_v44 = vpop.f32.mrb[3].mxu0  ;;  %v409_v45 = vadd.f32 %v393_v40, %v287_v33 }
 0x1af   :  { %v1538_v46 = vadd.f32 %v1530_v31, %v291_v44  ;;  %v408_v47 = vadd.f32 %v392_v41, %v282_v35 }
 0x1b0   :  { %v363_v48 = vmul.f32 %v1535_v43, %v1535_v43  ;;  %v425_v49 = vmul.f32 0.7978846, %v409_v45 }
 0x1b1   :  { %v362_v50 = vmul.f32 %v1538_v46, %v1538_v46  ;;  %v424_v51 = vmul.f32 0.7978846, %v408_v47 }
 0x1b2   :  { %v379_v52 = vmul.f32 %v363_v48, %v1535_v43  ;;  %1212 = vtanh.f32 %v425_v49 }
 0x1b3   :  { %v378_v53 = vmul.f32 %v362_v50, %v1538_v46  ;;  %1214 = vtanh.f32 %v424_v51 }
 0x1b4   :  { %v395_v54 = vmul.f32 0.044715, %v379_v52 }
 0x1b5   :  { %v394_v55 = vmul.f32 0.044715, %v378_v53  ;;  %v1099_v56 = vpop.f32.mrb[4].mxu0 }
 0x1b6   :  { %v411_v57 = vadd.f32 %v395_v54, %v1535_v43  ;;  %v1548_v58 = vadd.f32 %v1099_v56, %v1530_v31  ;;  %v301_v59 = vpop.f32.mrb[5].mxu0 }
 0x1b7   :  { %v410_v60 = vadd.f32 %v394_v55, %v1538_v46  ;;  %v1552_v61 = vadd.f32 %v1530_v31, %v301_v59 }
 0x1b8   :  { %v427_v62 = vmul.f32 0.7978846, %v411_v57  ;;  %v365_v63 = vmul.f32 %v1548_v58, %v1548_v58 }
 0x1b9   :  { %v426_v0 = vmul.f32 0.7978846, %v410_v60  ;;  %v364_v1 = vmul.f32 %v1552_v61, %v1552_v61 }
 0x1ba   :  { %1216 = vtanh.f32 %v427_v62  ;;  %v381_v2 = vmul.f32 %v365_v63, %v1548_v58 }
 0x1bb   :  { %1218 = vtanh.f32 %v426_v0  ;;  %v380_v3 = vmul.f32 %v364_v1, %v1552_v61 }
 0x1bc   :  { %v1213_v4 = vpop.eup %1212  ;;  %v397_v5 = vmul.f32 0.044715, %v381_v2 }
 0x1bd   :  { %v1215_v6 = vpop.eup %1214  ;;  %v396_v7 = vmul.f32 0.044715, %v380_v3  ;;  %v1102_v8 = vpop.f32.mrb[6].mxu0  ;;  %v457_v9 = vadd.f32 1.0, %v1213_v4 }
 0x1be   :  { %v413_v10 = vadd.f32 %v397_v5, %v1548_v58  ;;  %v1562_v11 = vadd.f32 %v1102_v8, %v1530_v31  ;;  %v311_v12 = vpop.f32.mrb[7].mxu0  ;;  %v456_v13 = vadd.f32 1.0, %v1215_v6 }
 0x1bf   :  { %v412_v14 = vadd.f32 %v396_v7, %v1552_v61  ;;  %v1566_v15 = vadd.f32 %v1530_v31, %v311_v12  ;;  %v473_v16 = vmul.f32 0.5, %v457_v9 }
 0x1c0   :  { %v429_v17 = vmul.f32 0.7978846, %v413_v10  ;;  %v367_v18 = vmul.f32 %v1562_v11, %v1562_v11  ;;  %v472_v19 = vmul.f32 0.5, %v456_v13 }
 0x1c1   :  { %v428_v20 = vmul.f32 0.7978846, %v412_v14  ;;  %v366_v21 = vmul.f32 %v1566_v15, %v1566_v15  ;;  %v489_v22 = vmul.f32 %v473_v16, %v287_v33 }
 0x1c2   :  { %1220 = vtanh.f32 %v429_v17  ;;  %v383_v23 = vmul.f32 %v367_v18, %v1562_v11  ;;  %v488_v24 = vmul.f32 %v472_v19, %v282_v35 }
 0x1c3   :  { %1222 = vtanh.f32 %v428_v20  ;;  %v382_v25 = vmul.f32 %v366_v21, %v1566_v15 }
 0x1c4   :  { %v1217_v26 = vpop.eup %1216  ;;  %v399_v27 = vmul.f32 0.044715, %v383_v23  ;;  %v504_v28 = vpack.c.bf16 %v489_v22, %v488_v24 }
 0x1c5   :  { %v1219_v29 = vpop.eup %1218  ;;  %v398_v30 = vmul.f32 0.044715, %v382_v25  ;;  %v1105_v32 = vpop.f32.mrb[8].mxu0  ;;  %v459_v34 = vadd.f32 1.0, %v1217_v26 }
 0x1c6   :  { %v415_v36 = vadd.f32 %v399_v27, %v1562_v11  ;;  %v1576_v37 = vadd.f32 %v1105_v32, %v1530_v31  ;;  %v321_v33 = vpop.f32.mrb[9].mxu0  ;;  %1131 = vmatprep.mubr.bf16.mxu1 %v504_v28  ;;  %v458_v38 = vadd.f32 1.0, %v1219_v29 }
 0x1c7   :  { %v414_v35 = vadd.f32 %v398_v30, %v1566_v15  ;;  %v1580_v39 = vadd.f32 %v1530_v31, %v321_v33  ;;  %v475_v40 = vmul.f32 0.5, %v459_v34 }
 0x1c8   :  { %v431_v41 = vmul.f32 0.7978846, %v415_v36  ;;  %v369_v42 = vmul.f32 %v1576_v37, %v1576_v37  ;;  %v474_v44 = vmul.f32 0.5, %v458_v38 }
 0x1c9   :  { %v430_v45 = vmul.f32 0.7978846, %v414_v35  ;;  %v368_v47 = vmul.f32 %v1580_v39, %v1580_v39  ;;  %v491_v48 = vmul.f32 %v475_v40, %v1535_v43 }
 0x1ca   :  { %1224 = vtanh.f32 %v431_v41  ;;  %v385_v49 = vmul.f32 %v369_v42, %v1576_v37  ;;  %v490_v50 = vmul.f32 %v474_v44, %v1538_v46 }
 0x1cb   :  { %1226 = vtanh.f32 %v430_v45  ;;  %v384_v51 = vmul.f32 %v368_v47, %v1580_v39 }
 0x1cc   :  { %v1221_v52 = vpop.eup %1220  ;;  %v401_v53 = vmul.f32 0.044715, %v385_v49  ;;  %v505_v54 = vpack.c.bf16 %v491_v48, %v490_v50 }
 0x1cd   :  { %v1223_v55 = vpop.eup %1222  ;;  %v400_v56 = vmul.f32 0.044715, %v384_v51  ;;  %v1108_v57 = vpop.f32.mrb[10].mxu0  ;;  %v461_v59 = vadd.f32 1.0, %v1221_v52 }
 0x1ce   :  { %v417_v60 = vadd.f32 %v401_v53, %v1576_v37  ;;  %v1592_v62 = vadd.f32 %v1108_v57, %v1530_v31  ;;  %v331_v43 = vpop.f32.mrb[11].mxu0  ;;  %1132 = vmatmul.mubr.bf16.vlgmr.msra.gmra.mrb[0].mxu1 %v505_v54  ;;  %v460_v63 = vadd.f32 1.0, %v1223_v55 }
 0x1cf   :  { %v416_v46 = vadd.f32 %v400_v56, %v1580_v39  ;;  %v1596_v0 = vadd.f32 %v1530_v31, %v331_v43  ;;  %v477_v1 = vmul.f32 0.5, %v461_v59 }
 0x1d0   :  { %v433_v2 = vmul.f32 0.7978846, %v417_v60  ;;  %v371_v3 = vmul.f32 %v1592_v62, %v1592_v62  ;;  %v476_v4 = vmul.f32 0.5, %v460_v63 }
 0x1d1   :  { %v432_v5 = vmul.f32 0.7978846, %v416_v46  ;;  %v370_v6 = vmul.f32 %v1596_v0, %v1596_v0  ;;  %v493_v7 = vmul.f32 %v477_v1, %v1548_v58 }
 0x1d2   :  { %1228 = vtanh.f32 %v433_v2  ;;  %v387_v8 = vmul.f32 %v371_v3, %v1592_v62  ;;  %v492_v9 = vmul.f32 %v476_v4, %v1552_v61 }
 0x1d3   :  { %1230 = vtanh.f32 %v432_v5  ;;  %v386_v10 = vmul.f32 %v370_v6, %v1596_v0 }
 0x1d4   :  { %v1225_v12 = vpop.eup %1224  ;;  %v403_v13 = vmul.f32 0.044715, %v387_v8  ;;  %v506_v14 = vpack.c.bf16 %v493_v7, %v492_v9 }
 0x1d5   :  { %v1227_v16 = vpop.eup %1226  ;;  %v402_v17 = vmul.f32 0.044715, %v386_v10  ;;  %v1111_v18 = vpop.f32.mrb[12].mxu0  ;;  %v463_v19 = vadd.f32 1.0, %v1225_v12 }
 0x1d6   :  { %v419_v20 = vadd.f32 %v403_v13, %v1592_v62  ;;  %v1608_v21 = vadd.f32 %v1111_v18, %v1530_v31  ;;  %v341_v58 = vpop.f32.mrb[13].mxu0  ;;  %1135 = vmatprep.mubr.bf16.mxu1 %v506_v14  ;;  %v462_v22 = vadd.f32 1.0, %v1227_v16 }
 0x1d7   :  { %v418_v61 = vadd.f32 %v402_v17, %v1596_v0  ;;  %v1612_v23 = vadd.f32 %v1530_v31, %v341_v58  ;;  %v479_v24 = vmul.f32 0.5, %v463_v19 }
 0x1d8   :  { %v435_v25 = vmul.f32 0.7978846, %v419_v20  ;;  %v373_v26 = vmul.f32 %v1608_v21, %v1608_v21  ;;  %v478_v27 = vmul.f32 0.5, %v462_v22 }
 0x1d9   :  { %v434_v28 = vmul.f32 0.7978846, %v418_v61  ;;  %v372_v29 = vmul.f32 %v1612_v23, %v1612_v23  ;;  %v495_v30 = vmul.f32 %v479_v24, %v1562_v11 }
 0x1da   :  { %1232 = vtanh.f32 %v435_v25  ;;  %v389_v32 = vmul.f32 %v373_v26, %v1608_v21  ;;  %v494_v34 = vmul.f32 %v478_v27, %v1566_v15 }
 0x1db   :  { %1234 = vtanh.f32 %v434_v28  ;;  %v388_v36 = vmul.f32 %v372_v29, %v1612_v23  ;;  %v1204_v29 = vld [vmem:[#allocation8] sm:$0xff]  }
 0x1dc   :  { %v1229_v33 = vpop.eup %1228  ;;  %v405_v38 = vmul.f32 0.044715, %v389_v32  ;;  %v507_v35 = vpack.c.bf16 %v495_v30, %v494_v34  ;;  %1147 = vmatprep.subr.bf16.mxu0 %v1204_v29  ;;  %v1205_v30 = vld [vmem:[#allocation8 + $0x8] sm:$0xff]   ;;  %v1208_v32 = vld [vmem:[#allocation8 + $0x20] sm:$0xff]  }
 0x1dd   :  { %v1231_v40 = vpop.eup %1230  ;;  %v404_v41 = vmul.f32 0.044715, %v388_v36  ;;  %v1114_v42 = vpop.f32.mrb[14].mxu0  ;;  %v465_v44 = vadd.f32 1.0, %v1229_v33  ;;  %1148 = vmatpush3.bf16.msra.mxu0 %v1204_v29  ;;  %v1209_v34 = vld [vmem:[#allocation8 + $0x28] sm:$0xff]   ;;  %v1210_v36 = vld [vmem:[#allocation8 + $0x30] sm:$0xff]  }
 0x1de   :  { %v421_v45 = vadd.f32 %v405_v38, %v1608_v21  ;;  %v357_v47 = vadd.f32 %v1114_v42, %v1530_v31  ;;  %v351_v11 = vpop.f32.mrb[15].mxu0  ;;  %1136 = vmatmul.mubr.bf16.gmra.mrb[4].mxu1 %v507_v35  ;;  %v464_v48 = vadd.f32 1.0, %v1231_v40  ;;  %1149 = vmatprep.subr.bf16.mxu0 %v1205_v30  ;;  %v1211_v33 = vld [vmem:[#allocation8 + $0x38] sm:$0xff]   ;;  %v1635_v38 = vld [vmem:[%s1773_s4] ss:$0 sm:$0xff] }
 0x1df   :  { %v420_v49 = vadd.f32 %v404_v41, %v1612_v23  ;;  %v352_v15 = vadd.f32 %v1530_v31, %v351_v11  ;;  %v481_v50 = vmul.f32 0.5, %v465_v44 }
 0x1e0   :  { %v437_v51 = vmul.f32 0.7978846, %v421_v45  ;;  %v375_v52 = vmul.f32 %v357_v47, %v357_v47  ;;  %v480_v53 = vmul.f32 0.5, %v464_v48 }
 0x1e1   :  { %v436_v54 = vmul.f32 0.7978846, %v420_v49  ;;  %v374_v55 = vmul.f32 %v352_v15, %v352_v15  ;;  %v497_v56 = vmul.f32 %v481_v50, %v1576_v37  ;;  %1150 = vmatpush3.bf16.msra.mxu0 %v1205_v30 }
 0x1e2   :  { %1236 = vtanh.f32 %v437_v51  ;;  %v391_v57 = vmul.f32 %v375_v52, %v357_v47  ;;  %v496_v59 = vmul.f32 %v480_v53, %v1580_v39 }
 0x1e3   :  { %1238 = vtanh.f32 %v436_v54  ;;  %v390_v60 = vmul.f32 %v374_v55, %v352_v15 }
 0x1e4   :  { %v1233_v43 = vpop.eup %1232  ;;  %v407_v63 = vmul.f32 0.044715, %v391_v57  ;;  %v508_v46 = vpack.c.bf16 %v497_v56, %v496_v59 }
 0x1e5   :  { %v1235_v1 = vpop.eup %1234  ;;  %v406_v2 = vmul.f32 0.044715, %v390_v60  ;;  %v467_v31 = vadd.f32 1.0, %v1233_v43 }
 0x1e6   :  { %v423_v3 = vadd.f32 %v407_v63, %v357_v47  ;;  %1139 = vmatprep.mubr.bf16.mxu1 %v508_v46  ;;  %v466_v4 = vadd.f32 1.0, %v1235_v1 }
 0x1e7   :  { %v422_v5 = vadd.f32 %v406_v2, %v352_v15  ;;  %v483_v6 = vmul.f32 0.5, %v467_v31 }
 0x1e8   :  { %v439_v7 = vmul.f32 0.7978846, %v423_v3  ;;  %v482_v8 = vmul.f32 0.5, %v466_v4 }
 0x1e9   :  { %v438_v37 = vmul.f32 0.7978846, %v422_v5  ;;  %v499_v9 = vmul.f32 %v483_v6, %v1592_v62 }
 0x1ea   :  { %1240 = vtanh.f32 %v439_v7  ;;  %v498_v39 = vmul.f32 %v482_v8, %v1596_v0 }
 0x1eb   :  { %1242 = vtanh.f32 %v438_v37 }
 0x1ec   :  { %v1237_v10 = vpop.eup %1236  ;;  %v509_v12 = vpack.c.bf16 %v499_v9, %v498_v39 }
 0x1ed   :  { %v1239_v13 = vpop.eup %1238  ;;  %v469_v14 = vadd.f32 1.0, %v1237_v10 }
 0x1ee   :  { %1140 = vmatmul.mubr.bf16.gmra.mrb[8].mxu1 %v509_v12  ;;  %v468_v16 = vadd.f32 1.0, %v1239_v13 }
 0x1ef   :  { %v485_v17 = vmul.f32 0.5, %v469_v14 }
 0x1f0   :  { %v484_v18 = vmul.f32 0.5, %v468_v16 }
 0x1f1   :  { %v501_v19 = vmul.f32 %v485_v17, %v1608_v21  ;;  %v1206_v21 = vld [vmem:[#allocation8 + $0x10] sm:$0xff]  }
 0x1f2   :  { %v500_v20 = vmul.f32 %v484_v18, %v1612_v23  ;;  %1151 = vmatprep.subr.bf16.mxu0 %v1206_v21  ;;  %v1207_v23 = vld [vmem:[#allocation8 + $0x18] sm:$0xff]  }
 0x1f3   :  { %1152 = vmatpush3.bf16.msra.mxu0 %v1206_v21 }
 0x1f4   :  { %v1241_v58 = vpop.eup %1240  ;;  %v510_v22 = vpack.c.bf16 %v501_v19, %v500_v20  ;;  %1153 = vmatprep.subr.bf16.mxu0 %v1207_v23 }
 0x1f5   :  { %v1243_v61 = vpop.eup %1242  ;;  %v471_v62 = vadd.f32 1.0, %v1241_v58 }
 0x1f6   :  { %1143 = vmatprep.mubr.bf16.mxu1 %v510_v22  ;;  %v470_v24 = vadd.f32 1.0, %v1243_v61 }
 0x1f7   :  { %v487_v0 = vmul.f32 0.5, %v471_v62  ;;  %1154 = vmatpush3.bf16.msra.mxu0 %v1207_v23 }
 0x1f8   :  { %v486_v25 = vmul.f32 0.5, %v470_v24  ;;  %1155 = vmatprep.subr.bf16.mxu0 %v1208_v32 }
 0x1f9   :  { %v503_v26 = vmul.f32 %v487_v0, %v357_v47 }
 0x1fa   :  { %v502_v27 = vmul.f32 %v486_v25, %v352_v15 }
 0x1fb   :  { %1156 = vmatpush3.bf16.msra.mxu0 %v1208_v32 }
 0x1fc   :  { %v511_v28 = vpack.c.bf16 %v503_v26, %v502_v27  ;;  %1157 = vmatprep.subr.bf16.mxu0 %v1209_v34 }
 0x1fe   :  { %1144 = vmatmul.mubr.bf16.gmra.mrb[12].mxu1 %v511_v28 }
 0x1ff   :  { %1158 = vmatpush3.bf16.msra.mxu0 %v1209_v34 }
 0x200   :  { %1159 = vmatprep.subr.bf16.mxu0 %v1210_v36 }
 0x203   :  { %1160 = vmatpush3.bf16.msra.mxu0 %v1210_v36 }
 0x204   :  { %1161 = vmatprep.subr.bf16.mxu0 %v1211_v33 }
 0x207   :  { %1162 = vmatpush3.bf16.msra.mxu0 %v1211_v33 }
 0x2a1   :  { %v1133_v35 = vpop.f32.mrb[0].mxu1 }
 0x2a2   :  { %v1638_v40 = vadd.f32 %v1133_v35, %v1635_v38  ;;  %v600_v41 = vpop.f32.mrb[1].mxu1 }
 0x2a3   :  { %v1641_v42 = vadd.f32 %v1635_v38, %v600_v41  ;;  %v1134_v44 = vpop.f32.mrb[2].mxu1 }
 0x2a4   :  { %v665_v45 = vmul.f32 %v1638_v40, %v1638_v40  ;;  %v1646_v47 = vadd.f32 %v1134_v44, %v1635_v38  ;;  %v603_v11 = vpop.f32.mrb[3].mxu1 }
 0x2a5   :  { %v663_v48 = vmul.f32 %v1641_v42, %v1641_v42  ;;  %v1651_v49 = vadd.f32 %v1635_v38, %v603_v11 }
 0x2a6   :  { %v681_v15 = vmul.f32 %v665_v45, %v1638_v40  ;;  %v666_v50 = vmul.f32 %v1646_v47, %v1646_v47 }
 0x2a7   :  { %v679_v51 = vmul.f32 %v663_v48, %v1641_v42  ;;  %v664_v52 = vmul.f32 %v1651_v49, %v1651_v49 }
 0x2a8   :  { %v697_v53 = vmul.f32 0.044715, %v681_v15  ;;  %v682_v54 = vmul.f32 %v666_v50, %v1646_v47 }
 0x2a9   :  { %v695_v55 = vmul.f32 0.044715, %v679_v51  ;;  %v680_v56 = vmul.f32 %v664_v52, %v1651_v49 }
 0x2aa   :  { %v713_v57 = vadd.f32 %v697_v53, %v1638_v40  ;;  %v698_v59 = vmul.f32 0.044715, %v682_v54 }
 0x2ab   :  { %v711_v60 = vadd.f32 %v695_v55, %v1641_v42  ;;  %v696_v43 = vmul.f32 0.044715, %v680_v56 }
 0x2ac   :  { %v729_v63 = vmul.f32 0.7978846, %v713_v57  ;;  %v714_v46 = vadd.f32 %v698_v59, %v1646_v47 }
 0x2ad   :  { %v727_v1 = vmul.f32 0.7978846, %v711_v60  ;;  %v712_v2 = vadd.f32 %v696_v43, %v1651_v49 }
 0x2ae   :  { %1244 = vtanh.f32 %v729_v63  ;;  %v730_v31 = vmul.f32 0.7978846, %v714_v46 }
 0x2af   :  { %1246 = vtanh.f32 %v727_v1  ;;  %v728_v3 = vmul.f32 0.7978846, %v712_v2 }
 0x2b0   :  { %1248 = vtanh.f32 %v730_v31 }
 0x2b1   :  { %1250 = vtanh.f32 %v728_v3  ;;  %v1137_v4 = vpop.f32.mrb[4].mxu1 }
 0x2b2   :  { %v1666_v5 = vadd.f32 %v1137_v4, %v1635_v38  ;;  %v616_v6 = vpop.f32.mrb[5].mxu1 }
 0x2b3   :  { %v1669_v7 = vadd.f32 %v1635_v38, %v616_v6  ;;  %v1138_v8 = vpop.f32.mrb[6].mxu1 }
 0x2b4   :  { %v669_v37 = vmul.f32 %v1666_v5, %v1666_v5  ;;  %v1674_v9 = vadd.f32 %v1138_v8, %v1635_v38  ;;  %v619_v39 = vpop.f32.mrb[7].mxu1 }
 0x2b5   :  { %v667_v10 = vmul.f32 %v1669_v7, %v1669_v7  ;;  %v1679_v12 = vadd.f32 %v1635_v38, %v619_v39 }
 0x2b6   :  { %v685_v13 = vmul.f32 %v669_v37, %v1666_v5  ;;  %v670_v14 = vmul.f32 %v1674_v9, %v1674_v9 }
 0x2b7   :  { %v683_v16 = vmul.f32 %v667_v10, %v1669_v7  ;;  %v668_v17 = vmul.f32 %v1679_v12, %v1679_v12 }
 0x2b8   :  { %v1245_v18 = vpop.eup %1244  ;;  %v701_v19 = vmul.f32 0.044715, %v685_v13  ;;  %v686_v20 = vmul.f32 %v670_v14, %v1674_v9 }
 0x2b9   :  { %v1247_v58 = vpop.eup %1246  ;;  %v761_v22 = vadd.f32 1.0, %v1245_v18  ;;  %v699_v61 = vmul.f32 0.044715, %v683_v16  ;;  %v684_v62 = vmul.f32 %v668_v17, %v1679_v12 }
 0x2ba   :  { %v1249_v24 = vpop.eup %1248  ;;  %v717_v0 = vadd.f32 %v701_v19, %v1666_v5  ;;  %v702_v25 = vmul.f32 0.044715, %v686_v20  ;;  %v759_v26 = vadd.f32 1.0, %v1247_v58 }
 0x2bb   :  { %v1251_v27 = vpop.eup %1250  ;;  %v777_v28 = vmul.f32 0.5, %v761_v22  ;;  %v762_v29 = vadd.f32 1.0, %v1249_v24  ;;  %v715_v30 = vadd.f32 %v699_v61, %v1669_v7  ;;  %v700_v21 = vmul.f32 0.044715, %v684_v62 }
 0x2bc   :  { %v733_v23 = vmul.f32 0.7978846, %v717_v0  ;;  %v718_v32 = vadd.f32 %v702_v25, %v1674_v9  ;;  %v760_v34 = vadd.f32 1.0, %v1251_v27  ;;  %v775_v36 = vmul.f32 0.5, %v759_v26 }
 0x2bd   :  { %v778_v33 = vmul.f32 0.5, %v762_v29  ;;  %v731_v35 = vmul.f32 0.7978846, %v715_v30  ;;  %v716_v41 = vadd.f32 %v700_v21, %v1679_v12  ;;  %v793_v11 = vmul.f32 %v777_v28, %v1638_v40 }
 0x2be   :  { %1252 = vtanh.f32 %v733_v23  ;;  %v734_v44 = vmul.f32 0.7978846, %v718_v32  ;;  %v776_v45 = vmul.f32 0.5, %v760_v34  ;;  %v791_v50 = vmul.f32 %v775_v36, %v1641_v42 }
 0x2bf   :  { %v794_v48 = vmul.f32 %v778_v33, %v1646_v47  ;;  %1254 = vtanh.f32 %v731_v35  ;;  %v732_v15 = vmul.f32 0.7978846, %v716_v41 }
 0x2c0   :  { %1256 = vtanh.f32 %v734_v44  ;;  %v792_v51 = vmul.f32 %v776_v45, %v1651_v49 }
 0x2c1   :  { %v808_v52 = vpack.c.bf16 %v794_v48, %v793_v11  ;;  %1258 = vtanh.f32 %v732_v15  ;;  %v1141_v53 = vpop.f32.mrb[8].mxu1 }
 0x2c2   :  { %v1698_v54 = vadd.f32 %v1141_v53, %v1635_v38  ;;  %v632_v55 = vpop.f32.mrb[9].mxu1  ;;  %v807_v56 = vpack.c.bf16 %v792_v51, %v791_v50 }
 0x2c3   :  { %v1701_v57 = vadd.f32 %v1635_v38, %v632_v55  ;;  %v1142_v40 = vpop.f32.mrb[10].mxu1 }
 0x2c4   :  { %v673_v47 = vmul.f32 %v1698_v54, %v1698_v54  ;;  %v1706_v59 = vadd.f32 %v1142_v40, %v1635_v38  ;;  %v635_v42 = vpop.f32.mrb[11].mxu1  ;;  %1163 = vmatprep.mubr.bf16.mxu0 %v807_v56 }
 0x2c5   :  { %v671_v49 = vmul.f32 %v1701_v57, %v1701_v57  ;;  %v1711_v60 = vadd.f32 %v1635_v38, %v635_v42  ;;  %1164 = vmatmul.mubr.bf16.vlgmr.msra.gmra.mrb[16].mxu0 %v808_v52 }
 0x2c6   :  { %v689_v43 = vmul.f32 %v673_v47, %v1698_v54  ;;  %v674_v63 = vmul.f32 %v1706_v59, %v1706_v59 }
 0x2c7   :  { %v687_v46 = vmul.f32 %v671_v49, %v1701_v57  ;;  %v672_v1 = vmul.f32 %v1711_v60, %v1711_v60 }
 0x2c8   :  { %v1253_v2 = vpop.eup %1252  ;;  %v705_v31 = vmul.f32 0.044715, %v689_v43  ;;  %v690_v3 = vmul.f32 %v674_v63, %v1706_v59 }
 0x2c9   :  { %v1255_v4 = vpop.eup %1254  ;;  %v703_v6 = vmul.f32 0.044715, %v687_v46  ;;  %v688_v8 = vmul.f32 %v672_v1, %v1711_v60  ;;  %v765_v37 = vadd.f32 1.0, %v1253_v2 }
 0x2ca   :  { %v1257_v39 = vpop.eup %1256  ;;  %v721_v10 = vadd.f32 %v705_v31, %v1698_v54  ;;  %v706_v13 = vmul.f32 0.044715, %v690_v3  ;;  %v763_v14 = vadd.f32 1.0, %v1255_v4 }
 0x2cb   :  { %v1259_v16 = vpop.eup %1258  ;;  %v719_v17 = vadd.f32 %v703_v6, %v1701_v57  ;;  %v704_v18 = vmul.f32 0.044715, %v688_v8  ;;  %v766_v19 = vadd.f32 1.0, %v1257_v39  ;;  %v781_v20 = vmul.f32 0.5, %v765_v37 }
 0x2cc   :  { %v737_v58 = vmul.f32 0.7978846, %v721_v10  ;;  %v722_v22 = vadd.f32 %v706_v13, %v1706_v59  ;;  %v764_v61 = vadd.f32 1.0, %v1259_v16  ;;  %v779_v62 = vmul.f32 0.5, %v763_v14 }
 0x2cd   :  { %v735_v24 = vmul.f32 0.7978846, %v719_v17  ;;  %v720_v0 = vadd.f32 %v704_v18, %v1711_v60  ;;  %v782_v25 = vmul.f32 0.5, %v766_v19  ;;  %v797_v29 = vmul.f32 %v781_v20, %v1666_v5 }
 0x2ce   :  { %1260 = vtanh.f32 %v737_v58  ;;  %v738_v26 = vmul.f32 0.7978846, %v722_v22  ;;  %v780_v27 = vmul.f32 0.5, %v764_v61  ;;  %v795_v21 = vmul.f32 %v779_v62, %v1669_v7 }
 0x2cf   :  { %1262 = vtanh.f32 %v735_v24  ;;  %v736_v28 = vmul.f32 0.7978846, %v720_v0  ;;  %v798_v30 = vmul.f32 %v782_v25, %v1674_v9 }
 0x2d0   :  { %1264 = vtanh.f32 %v738_v26  ;;  %v796_v23 = vmul.f32 %v780_v27, %v1679_v12 }
 0x2d1   :  { %1266 = vtanh.f32 %v736_v28  ;;  %v1145_v32 = vpop.f32.mrb[12].mxu1  ;;  %v810_v34 = vpack.c.bf16 %v798_v30, %v797_v29 }
 0x2d2   :  { %v1730_v36 = vadd.f32 %v1145_v32, %v1635_v38  ;;  %v648_v33 = vpop.f32.mrb[13].mxu1  ;;  %v809_v35 = vpack.c.bf16 %v796_v23, %v795_v21 }
 0x2d3   :  { %v1733_v41 = vadd.f32 %v1635_v38, %v648_v33  ;;  %v1146_v44 = vpop.f32.mrb[14].mxu1 }
 0x2d4   :  { %v677_v5 = vmul.f32 %v1730_v36, %v1730_v36  ;;  %v660_v9 = vadd.f32 %v1146_v44, %v1635_v38  ;;  %v651_v7 = vpop.f32.mrb[15].mxu1  ;;  %1167 = vmatprep.mubr.bf16.mxu0 %v809_v35 }
 0x2d5   :  { %v675_v12 = vmul.f32 %v1733_v41, %v1733_v41  ;;  %v652_v45 = vadd.f32 %v1635_v38, %v651_v7  ;;  %1168 = vmatmul.mubr.bf16.gmra.mrb[20].mxu0 %v810_v34  ;;  %v1028_v7 = vld [vmem:[%s1775_s6] ss:$0 sm:$0xff]  ;;  %s1403_s6 = smov [#allocation10]  }
 0x2d6   :  { %v693_v11 = vmul.f32 %v677_v5, %v1730_v36  ;;  %v678_v48 = vmul.f32 %v660_v9, %v660_v9  ;;  %s987_s8 = sshll.u32 %s1403_s6, 4  ;;  %s988_s8 = int_to_ptr.vmem [resolvable:$true] %s987_s8 }
 0x2d7   :  { %v691_v15 = vmul.f32 %v675_v12, %v1733_v41  ;;  %v676_v50 = vmul.f32 %v652_v45, %v652_v45  ;;  %s1364_s9 = scalar_lea.vmem %s988_s8, 512  ;;  %p1369_p5 = scmp.lt.s32.totalorder %s988_s8, %s988_s8 }
 0x2d8   :  { %v1261_v51 = vpop.eup %1260  ;;  %v709_v52 = vmul.f32 0.044715, %v693_v11  ;;  %v694_v53 = vmul.f32 %v678_v48, %v660_v9  ;;  %p1365_p4 = scmp.ne.s32.totalorder %s988_s8, %s1364_s9  ;;  %p1370_p6 = scmp.lt.s32.totalorder %s1364_s9, %s1364_s9 }
 0x2d9   :  { %v1263_v55 = vpop.eup %1262  ;;  %v707_v56 = vmul.f32 0.044715, %v691_v15  ;;  %v692_v40 = vmul.f32 %v676_v50, %v652_v45  ;;  %v769_v47 = vadd.f32 1.0, %v1261_v51 }
 0x2da   :  { %v1265_v42 = vpop.eup %1264  ;;  %v725_v49 = vadd.f32 %v709_v52, %v1730_v36  ;;  %v710_v43 = vmul.f32 0.044715, %v694_v53  ;;  %v767_v63 = vadd.f32 1.0, %v1263_v55  ;;  %p1371_p7 = por %p1370_p6, %p1369_p5 }
 0x2db   :  { %v1267_v38 = vpop.eup %1266  ;;  %v723_v46 = vadd.f32 %v707_v56, %v1733_v41  ;;  %v708_v1 = vmul.f32 0.044715, %v692_v40  ;;  %v770_v2 = vadd.f32 1.0, %v1265_v42  ;;  %v785_v31 = vmul.f32 0.5, %v769_v47 }
 0x2dc   :  { %v741_v3 = vmul.f32 0.7978846, %v725_v49  ;;  %v726_v4 = vadd.f32 %v710_v43, %v660_v9  ;;  %v768_v6 = vadd.f32 1.0, %v1267_v38  ;;  %v783_v8 = vmul.f32 0.5, %v767_v63  ;;  %p1372_p8 = pnand %p1371_p7, %p1365_p4 }
 0x2dd   :  { %v739_v37 = vmul.f32 0.7978846, %v723_v46  ;;  %v724_v39 = vadd.f32 %v708_v1, %v652_v45  ;;  %v786_v10 = vmul.f32 0.5, %v770_v2  ;;  %v801_v17 = vmul.f32 %v785_v31, %v1698_v54 }
 0x2de   :  { %1268 = vtanh.f32 %v741_v3  ;;  %v742_v13 = vmul.f32 0.7978846, %v726_v4  ;;  %v784_v14 = vmul.f32 0.5, %v768_v6  ;;  %v799_v19 = vmul.f32 %v783_v8, %v1701_v57 }
 0x2df   :  { %1270 = vtanh.f32 %v739_v37  ;;  %v740_v16 = vmul.f32 0.7978846, %v724_v39  ;;  %v802_v18 = vmul.f32 %v786_v10, %v1706_v59 }
 0x2e0   :  { %1272 = vtanh.f32 %v742_v13  ;;  %v800_v20 = vmul.f32 %v784_v14, %v1711_v60 }
 0x2e1   :  { %1274 = vtanh.f32 %v740_v16  ;;  %v812_v58 = vpack.c.bf16 %v802_v18, %v801_v17 }
 0x2e2   :  { %v811_v22 = vpack.c.bf16 %v800_v20, %v799_v19 }
 0x2e4   :  { %1171 = vmatprep.mubr.bf16.mxu0 %v811_v22 }
 0x2e5   :  { %1172 = vmatmul.mubr.bf16.gmra.mrb[24].mxu0 %v812_v58 }
 0x2e8   :  { %v1269_v61 = vpop.eup %1268 }
 0x2e9   :  { %v1271_v62 = vpop.eup %1270  ;;  %v773_v24 = vadd.f32 1.0, %v1269_v61 }
 0x2ea   :  { %v1273_v0 = vpop.eup %1272  ;;  %v771_v25 = vadd.f32 1.0, %v1271_v62 }
 0x2eb   :  { %v1275_v26 = vpop.eup %1274  ;;  %v774_v27 = vadd.f32 1.0, %v1273_v0  ;;  %v789_v54 = vmul.f32 0.5, %v773_v24 }
 0x2ec   :  { %v772_v28 = vadd.f32 1.0, %v1275_v26  ;;  %v787_v59 = vmul.f32 0.5, %v771_v25 }
 0x2ed   :  { %v790_v29 = vmul.f32 0.5, %v774_v27  ;;  %v805_v57 = vmul.f32 %v789_v54, %v1730_v36 }
 0x2ee   :  { %v788_v30 = vmul.f32 0.5, %v772_v28  ;;  %v803_v21 = vmul.f32 %v787_v59, %v1733_v41 }
 0x2ef   :  { %v806_v60 = vmul.f32 %v790_v29, %v660_v9 }
 0x2f0   :  { %v804_v23 = vmul.f32 %v788_v30, %v652_v45 }
 0x2f1   :  { %v814_v32 = vpack.c.bf16 %v806_v60, %v805_v57 }
 0x2f2   :  { %v813_v34 = vpack.c.bf16 %v804_v23, %v803_v21 }
 0x2f4   :  { %1175 = vmatprep.mubr.bf16.mxu0 %v813_v34 }
 0x2f5   :  { %1176 = vmatmul.mubr.bf16.gmra.mrb[28].mxu0 %v814_v32 }
 0x398   :  { %v1165_v33 = vpop.f32.mrb[16].mxu0 }
 0x399   :  { %v903_v35 = vpop.f32.mrb[17].mxu0  ;;  %v912_v11 = vadd.f32 %v1165_v33, %v1028_v7 }
 0x39a   :  { %v1166_v44 = vpop.f32.mrb[18].mxu0  ;;  %v904_v9 = vadd.f32 %v1028_v7, %v903_v35 }
 0x39b   :  { %v906_v5 = vpop.f32.mrb[19].mxu0  ;;  %v915_v45 = vadd.f32 %v1166_v44, %v1028_v7 }
 0x39c   :  { %v907_v53 = vadd.f32 %v1028_v7, %v906_v5 }
 0x3a8   :  { %v1169_v12 = vpop.f32.mrb[20].mxu0 }
 0x3a9   :  { %v928_v48 = vadd.f32 %v1169_v12, %v1028_v7  ;;  %v919_v36 = vpop.f32.mrb[21].mxu0 }
 0x3aa   :  { %v920_v15 = vadd.f32 %v1028_v7, %v919_v36  ;;  %v1170_v41 = vpop.f32.mrb[22].mxu0 }
 0x3ab   :  { %v968_v50 = vmax.f32 %v912_v11, %v928_v48  ;;  %v931_v51 = vadd.f32 %v1170_v41, %v1028_v7  ;;  %v922_v52 = vpop.f32.mrb[23].mxu0 }
 0x3ac   :  { %v966_v55 = vmax.f32 %v904_v9, %v920_v15  ;;  %v923_v56 = vadd.f32 %v1028_v7, %v922_v52 }
 0x3ad   :  { %v969_v40 = vmax.f32 %v915_v45, %v931_v51 }
 0x3ae   :  { %v967_v47 = vmax.f32 %v907_v53, %v923_v56 }
 0x3b8   :  { %v1173_v42 = vpop.f32.mrb[24].mxu0 }
 0x3b9   :  { %v944_v49 = vadd.f32 %v1173_v42, %v1028_v7  ;;  %v935_v43 = vpop.f32.mrb[25].mxu0 }
 0x3ba   :  { %v936_v63 = vadd.f32 %v1028_v7, %v935_v43  ;;  %v1174_v38 = vpop.f32.mrb[26].mxu0 }
 0x3bb   :  { %v972_v46 = vmax.f32 %v968_v50, %v944_v49  ;;  %v947_v1 = vadd.f32 %v1174_v38, %v1028_v7  ;;  %v938_v2 = vpop.f32.mrb[27].mxu0 }
 0x3bc   :  { %v970_v31 = vmax.f32 %v966_v55, %v936_v63  ;;  %v939_v3 = vadd.f32 %v1028_v7, %v938_v2 }
 0x3bd   :  { %v973_v4 = vmax.f32 %v969_v40, %v947_v1 }
 0x3be   :  { %v971_v6 = vmax.f32 %v967_v47, %v939_v3 }
 0x3c8   :  { %v1177_v8 = vpop.f32.mrb[28].mxu0 }
 0x3c9   :  { %v960_v37 = vadd.f32 %v1177_v8, %v1028_v7  ;;  %v951_v39 = vpop.f32.mrb[29].mxu0 }
 0x3ca   :  { %v952_v10 = vadd.f32 %v1028_v7, %v951_v39  ;;  %v1178_v13 = vpop.f32.mrb[30].mxu0 }
 0x3cb   :  { %v976_v14 = vmax.f32 %v972_v46, %v960_v37  ;;  %v963_v16 = vadd.f32 %v1178_v13, %v1028_v7  ;;  %v954_v17 = vpop.f32.mrb[31].mxu0 }
 0x3cc   :  { %v974_v18 = vmax.f32 %v970_v31, %v952_v10  ;;  %v955_v19 = vadd.f32 %v1028_v7, %v954_v17 }
 0x3cd   :  { %980 = vst [vmem:[#allocation10 + $0x10] sm:$0xff] %v976_v14  ;;  %v977_v20 = vmax.f32 %v973_v4, %v963_v16 }
 0x3ce   :  { %978 = vst [vmem:[#allocation10] sm:$0xff] %v974_v18  ;;  %v975_v58 = vmax.f32 %v971_v6, %v955_v19 }
 0x3cf   :  { %981 = vst [vmem:[#allocation10 + $0x18] sm:$0xff] %v977_v20 }
 0x3d0   :  { %979 = vst [vmem:[#allocation10 + $0x8] sm:$0xff] %v975_v58 }
 0x3d1   :  { %1375 = shalt.err (!%p1372_p8)
}
 0x3d2   :  { %s1376_s14 = scalar_lea.hbm %s1776_s7, 512 }
 0x3d3   :  { %p1377_p9 = scmp.ne.s32.totalorder %s1776_s7, %s1376_s14  ;;  %p1380_p10 = scmp.lt.u32.totalorder %s1376_s14, %s1776_s7 }
 0x3d5   :  { %p1382_p11 = pnand %p1380_p10, %p1377_p9 }
 0x3d7   :  { %1385 = shalt.err (!%p1382_p11)
}
 0x3d8   :  { %993 = dma.vmem_to_hbm [thread:$0]  %s988_s8, 512, %s1776_s7, [#allocation4], %s1395_s11, %s1395_s11, %s1396_s12  }
 0x3d9   :  { %1392 = dma.done.wait [#allocation4], 512  }
 0x3da   :  { %1393 = vsyncadd [#allocation4], 4294966784 }
 0x3db   :  { %997 = vsyncpa [#allocation3], 1 }
 0x3dc   :  { %998 = vsyncpa [#allocation6], 1 }
 0x3dd   :  { %999 = vsyncpa [#allocation9], 1 }
 0x3de   :  { %1000 = vsyncpa [#allocation4], 1 }

</bundles_post_ra>
